<compile_context>
chip_gen: v5e
topology: v5e:2x2
jax: 0.10.0
libtpu: 0.0.40
codegen_flags: <defaults>
</compile_context>

<pallas_src>
import functools

import jax
import jax.numpy as jnp
from jax.experimental import pallas as pl
from jax.experimental.pallas import tpu as pltpu

_MIB = 1024 * 1024
# Resident-W VMEM budget chosen to be safe on v7x (64 MiB per TensorCore,
# 32 MiB default scoped limit); v5e/v6e have 128 MiB physical VMEM.
_RESIDENT_VMEM_BUDGET = 40 * _MIB
_DEFAULT_SCOPED_VMEM = 32 * _MIB


def _round_up(a: int, b: int) -> int:
    return ((a + b - 1) // b) * b


# --------------------------------------------------------------------------
# Path A kernel: W fully resident in VMEM, single K pass per output tile.
# --------------------------------------------------------------------------
def _fused_kernel(x_ref, w_ref, b_ref, o_ref, *, compute_dtype):
    # x_ref: (tm, Cv), w_ref: (Cv, Ct) resident, b_ref: (1, Ct) f32,
    # o_ref: (tm, Ct).
    x = x_ref[...]
    if compute_dtype is not None and x.dtype != compute_dtype:
        x = x.astype(compute_dtype)  # per-tile downcast rides the VPU slot
    acc = jnp.dot(x, w_ref[...], preferred_element_type=jnp.float32)
    o_ref[...] = (acc + b_ref[...]).astype(o_ref.dtype)


# --------------------------------------------------------------------------
# Path B kernel: streamed, K-tiled fallback (very large weights / huge Cv).
# --------------------------------------------------------------------------
def _tiled_kernel(x_ref, w_ref, b_ref, o_ref, acc_ref, *, compute_dtype):
    k = pl.program_id(2)

    @pl.when(k == 0)
    def _():
        acc_ref[...] = jnp.zeros_like(acc_ref)

    x = x_ref[...]
    w = w_ref[...]
    if compute_dtype is not None:
        if x.dtype != compute_dtype:
            x = x.astype(compute_dtype)
        if w.dtype != compute_dtype:
            w = w.astype(compute_dtype)
    acc_ref[...] += jnp.dot(x, w, preferred_element_type=jnp.float32)

    @pl.when(k == pl.num_programs(2) - 1)
    def _():
        o_ref[...] = (acc_ref[...] + b_ref[...]).astype(o_ref.dtype)


def multimodal_projector(x, weight, bias, *, compute_dtype=jnp.bfloat16,
                         force_streamed=False, tm=None, tn=256, tk=512):
    """out = x @ weight + bias (PyTorch nn.Linear on the last dim).

    x:      [..., Cv]
    weight: [Cv, Ct]  (transposed vs. PyTorch's [out, in])
    bias:   [Ct]
    compute_dtype: dtype of the MXU operands (accumulation is always f32).
    """
    orig_shape = x.shape
    cv = int(orig_shape[-1])
    ct = int(weight.shape[1])
    out_dtype = x.dtype

    x2d = x.reshape(-1, cv)  # view, no HBM copy
    m = int(x2d.shape[0])

    # One-time parameter prep (in a real model, do at init so it's amortized).
    if compute_dtype is not None and weight.dtype != compute_dtype:
        weight = weight.astype(compute_dtype)
    bias2d = bias.astype(jnp.float32).reshape(1, ct)

    x_itemsize = jnp.dtype(x2d.dtype).itemsize
    w_itemsize = jnp.dtype(weight.dtype).itemsize
    out_itemsize = jnp.dtype(out_dtype).itemsize
    w_bytes = cv * ct * w_itemsize
    flops = 2 * m * cv * ct

    # ---------------- Path A: resident W, K collapsed ----------------
    def _resident_vmem(tm_):
        # 2x W (Pallas double-buffers inputs even with a constant block index),
        # double-buffered x / out tiles, f32 matmul result, bias.
        return (2 * w_bytes
                + 2 * tm_ * cv * x_itemsize
                + 2 * tm_ * ct * out_itemsize
                + tm_ * ct * 4
                + 2 * ct * 4)

    use_resident = not force_streamed
    tm_a = None
    if use_resident:
        cap = min(tm if tm is not None else 512, _round_up(m, 8))
        for cand in (512, 384, 256, 128, 64, 32, 16, 8):
            cand = min(cand, cap)
            if _resident_vmem(cand) <= _RESIDENT_VMEM_BUDGET:
                tm_a = cand
                break
        if tm_a is None:
            use_resident = False

    if use_resident:
        est_vmem = _resident_vmem(tm_a)
        vmem_limit = None
        if est_vmem > _DEFAULT_SCOPED_VMEM - 4 * _MIB:
            vmem_limit = min(int(est_vmem) + 8 * _MIB, 48 * _MIB)

        bytes_accessed = int(m * cv * x_itemsize + w_bytes + ct * 4
                             + m * ct * out_itemsize)
        kernel = functools.partial(_fused_kernel, compute_dtype=compute_dtype)
        out = pl.pallas_call(
            kernel,
            out_shape=jax.ShapeDtypeStruct((m, ct), out_dtype),
            grid=(pl.cdiv(m, tm_a),),
            in_specs=[
                # x tile streams over M; ragged last tile handled by Pallas.
                pl.BlockSpec((tm_a, cv), lambda i: (i, 0)),
                # Constant block index -> W DMAed into VMEM once, reused for
                # every M tile (no HBM re-streaming).
                pl.BlockSpec((cv, ct), lambda i: (0, 0)),
                pl.BlockSpec((1, ct), lambda i: (0, 0)),
            ],
            out_specs=pl.BlockSpec((tm_a, ct), lambda i: (i, 0)),
            compiler_params=pltpu.CompilerParams(
                dimension_semantics=("parallel",),
                vmem_limit_bytes=vmem_limit,
            ),
            cost_estimate=pl.CostEstimate(
                flops=flops, transcendentals=0,
                bytes_accessed=bytes_accessed),
        )(x2d, weight, bias2d)
        return out.reshape(*orig_shape[:-1], ct)

    # ---------------- Path B: streamed, K-tiled fallback ----------------
    tm_b = min(tm if tm is not None else 256, _round_up(m, 8))
    tn_b = ct if ct <= tn else tn            # tn must be a multiple of 128
    tk_b = cv if cv <= 2048 else min(tk, _round_up(cv, 128))

    cv_p = _round_up(cv, tk_b)
    if cv_p != cv:
        # K must stay zero-padded: ragged K blocks would feed garbage into the
        # reduction.  (Ragged M / N edges are handled by Pallas masking.)
        x2d = jnp.pad(x2d, ((0, 0), (0, cv_p - cv)))
        weight = jnp.pad(weight, ((0, cv_p - cv), (0, 0)))

    grid = (pl.cdiv(m, tm_b), pl.cdiv(ct, tn_b), cv_p // tk_b)
    bytes_accessed = int(grid[1] * m * cv_p * x_itemsize   # x re-streamed per N tile
                         + grid[0] * cv_p * ct * w_itemsize  # W re-streamed per M tile
                         + ct * 4 + m * ct * out_itemsize)
    kernel = functools.partial(_tiled_kernel, compute_dtype=compute_dtype)
    out = pl.pallas_call(
        kernel,
        out_shape=jax.ShapeDtypeStruct((m, ct), out_dtype),
        grid=grid,
        in_specs=[
            pl.BlockSpec((tm_b, tk_b), lambda i, j, k: (i, k)),
            pl.BlockSpec((tk_b, tn_b), lambda i, j, k: (k, j)),
            pl.BlockSpec((1, tn_b), lambda i, j, k: (0, j)),
        ],
        out_specs=pl.BlockSpec((tm_b, tn_b), lambda i, j, k: (i, j)),
        scratch_shapes=[pltpu.VMEM((tm_b, tn_b), jnp.float32)],
        compiler_params=pltpu.CompilerParams(
            dimension_semantics=("parallel", "parallel", "arbitrary")),
        cost_estimate=pl.CostEstimate(
            flops=flops, transcendentals=0, bytes_accessed=bytes_accessed),
    )(x2d, weight, bias2d)
    return out.reshape(*orig_shape[:-1], ct)


if __name__ == "__main__":
    # Small shapes consistent with the module: batch=2, seq=8,
    # visionEmbeddingChannels=32, textEmbeddingChannels=64.
    B, S, C_VISION, C_TEXT = 2, 8, 32, 64

    key = jax.random.PRNGKey(0)
    kx, kw, kb = jax.random.split(key, 3)

    # Deterministic init (mimics nn.Linear's uniform(-1/sqrt(in), 1/sqrt(in))).
    bound = 1.0 / (C_VISION ** 0.5)
    weight = jax.random.uniform(kw, (C_VISION, C_TEXT), jnp.float32, -bound, bound)
    bias = jax.random.uniform(kb, (C_TEXT,), jnp.float32, -bound, bound)
    x = jax.random.normal(kx, (B, S, C_VISION), jnp.float32)

    ref = x @ weight + bias

    # Default path: resident W, bf16 MXU operands, f32 accumulation.
    out = jax.block_until_ready(multimodal_projector(x, weight, bias))
    assert out.shape == (B, S, C_TEXT)
    assert jnp.allclose(out, ref, atol=5e-2, rtol=5e-2), "bf16 resident path mismatch"

    # Exact f32-operand resident path.
    out_f32 = jax.block_until_ready(
        multimodal_projector(x, weight, bias, compute_dtype=jnp.float32))
    assert out_f32.shape == (B, S, C_TEXT)
    assert jnp.allclose(out_f32, ref, atol=1e-5, rtol=1e-5), "f32 resident path mismatch"

    # Streamed / K-tiled fallback path (exercised here at small shape).
    out_stream = jax.block_until_ready(
        multimodal_projector(x, weight, bias, compute_dtype=jnp.float32,
                             force_streamed=True))
    assert out_stream.shape == (B, S, C_TEXT)
    assert jnp.allclose(out_stream, ref, atol=1e-5, rtol=1e-5), "streamed path mismatch"

    print("KERNEL_OK")
</pallas_src>

<mosaic_0001>
module attributes {stable_mosaic.version = 11 : i64} {
  func.func @_fused_kernel(%arg0: i32, %arg1: memref<16x32xf32, #tpu.memory_space<vmem>>, %arg2: memref<32x64xbf16, #tpu.memory_space<vmem>>, %arg3: memref<1x64xf32, #tpu.memory_space<vmem>>, %arg4: memref<16x64xf32, #tpu.memory_space<vmem>>) attributes {dimension_semantics = [#tpu.dimension_semantics<parallel>], iteration_bounds = array<i64: 1>, scalar_prefetch = 0 : i64, scratch_operands = 0 : i64, tpu.core_type = #tpu.core_type<tc>, window_params = [{transform_indices = @transform_0, window_bounds = array<i64: 16, 32>}, {pipeline_mode = #tpu.pipeline_mode<synchronous>, transform_indices = @transform_1, window_bounds = array<i64: 32, 64>}, {pipeline_mode = #tpu.pipeline_mode<synchronous>, transform_indices = @transform_2, window_bounds = array<i64: 1, 64>}, {transform_indices = @transform_3, window_bounds = array<i64: 16, 64>}]} {
    %c0 = arith.constant 0 : index
    %c0_0 = arith.constant 0 : index
    %0 = vector.load %arg1[%c0, %c0_0] : memref<16x32xf32, #tpu.memory_space<vmem>>, vector<16x32xf32>
    %1 = arith.truncf %0 : vector<16x32xf32> to vector<16x32xbf16>
    %c0_1 = arith.constant 0 : index
    %c0_2 = arith.constant 0 : index
    %2 = vector.load %arg2[%c0_1, %c0_2] : memref<32x64xbf16, #tpu.memory_space<vmem>>, vector<32x64xbf16>
    %cst = arith.constant dense<0.000000e+00> : vector<16x64xf32>
    %3 = tpu.matmul %1, %2, %cst {dimension_numbers = #tpu.dot_dimension_numbers<[1], [0], [0], [1], [0, 0, 1, 1], [], []>} : vector<16x32xbf16>, vector<32x64xbf16>, vector<16x64xf32> -> vector<16x64xf32>
    %c0_3 = arith.constant 0 : index
    %c0_4 = arith.constant 0 : index
    %4 = vector.load %arg3[%c0_3, %c0_4] : memref<1x64xf32, #tpu.memory_space<vmem>>, vector<1x64xf32>
    %5 = vector.broadcast %4 : vector<1x64xf32> to vector<16x64xf32>
    %6 = arith.addf %3, %5 : vector<16x64xf32>
    %c0_5 = arith.constant 0 : index
    %c0_6 = arith.constant 0 : index
    %7 = vector.load %arg4[%c0_5, %c0_6] : memref<16x64xf32, #tpu.memory_space<vmem>>, vector<16x64xf32>
    tpu.vector_store %arg4[%c0_5, %c0_6], %6 {strides = array<i32>} : memref<16x64xf32, #tpu.memory_space<vmem>>, vector<16x64xf32>,
    return
  }
  func.func @transform_0(%arg0: i32) -> (i32, i32) {
    %c0_i32 = arith.constant 0 : i32
    %c0_i32_0 = arith.constant 0 : i32
    return %arg0, %c0_i32 : i32, i32
  }
  func.func @transform_1(%arg0: i32) -> (i32, i32) {
    %c0_i32 = arith.constant 0 : i32
    %c0_i32_0 = arith.constant 0 : i32
    %c0_i32_1 = arith.constant 0 : i32
    return %c0_i32, %c0_i32_0 : i32, i32
  }
  func.func @transform_2(%arg0: i32) -> (i32, i32) {
    %c0_i32 = arith.constant 0 : i32
    %c0_i32_0 = arith.constant 0 : i32
    %c0_i32_1 = arith.constant 0 : i32
    return %c0_i32, %c0_i32_0 : i32, i32
  }
  func.func @transform_3(%arg0: i32) -> (i32, i32) {
    %c0_i32 = arith.constant 0 : i32
    %c0_i32_0 = arith.constant 0 : i32
    return %arg0, %c0_i32 : i32, i32
  }
}

</mosaic_0001>

<bundles_post_ra>
// kernel: tpu_custom_call.1
= control target key start
LH: loop header
LB: loop body
LE: loop exit
PB: predicated region body
PF: predicated region fallthrough
CT: control target
= control target key end

     0   :  { %8 = vsyncpa [#allocation3], 0  ;;  %s254_s0 = inlined_call_operand.hbm [shape: f32[16,32], index: 0, kind: input, shape index: {}]   ;;  %s255_s1 = inlined_call_operand.hbm [shape: bf16[32,64], index: 1, kind: input, shape index: {}]   ;;  %s256_s2 = inlined_call_operand.vmem [shape: f32[1,64], index: 2, kind: input, shape index: {}]   ;;  %s257_s3 = inlined_call_operand.hbm [shape: f32[16,64], index: 3, kind: output, shape index: {}]  }
   0x1   :  { %9 = vsyncpa [#allocation6], 0 }
   0x2   :  { %10 = vsyncpa [#allocation4], 0  ;;  %s15_s14 = sshll.u32 %s254_s0, 4  ;;  %s209_s15 = smov [#allocation2]   ;;  %s16_s14 = int_to_ptr.hbm [resolvable:$true] %s15_s14 }
   0x3   :  { %s17_s16 = sshll.u32 %s209_s15, 4  ;;  %s28_s19 = sshll.u32 %s255_s1, 4  ;;  %s18_s16 = int_to_ptr.vmem [resolvable:$true] %s17_s16  ;;  %s29_s19 = int_to_ptr.hbm [resolvable:$true] %s28_s19 }
   0x4   :  { %s210_s20 = smov 128   ;;  %s211_s21 = smov 8  }
   0x5   :  { %23 = dma.hbm_to_vmem [thread:$0]  %s16_s14, 256, %s18_s16, [#allocation3], %s210_s20, %s210_s20, %s211_s21  }
   0x6   :  { %s212_s22 = smov [#allocation5]   ;;  %s213_s24 = smov 64  }
   0x7   :  { %s30_s23 = sshll.u32 %s212_s22, 4  ;;  %s214_s0 = smov 4   ;;  %s31_s23 = int_to_ptr.vmem [resolvable:$true] %s30_s23 }
   0x8   :  { %36 = dma.hbm_to_vmem [thread:$0]  %s29_s19, 256, %s31_s23, [#allocation6], %s213_s24, %s213_s24, %s214_s0  }
   0x9   :  { %203 = dma.done.wait [#allocation3], 256  }
   0xa   :  { %204 = vsyncadd [#allocation3], 4294967040 }
   0xb   :  { %205 = dma.done.wait [#allocation6], 256  }
   0xc   :  { %206 = vsyncadd [#allocation6], 4294967040  ;;  %v122_v0 = vld [vmem:[#allocation5 + $0x8] sm:$0xff]  ;;  %v121_v1 = vld [vmem:[#allocation5] sm:$0xff]  ;;  %vm71_vm0 = vcmask 261120   ;;  %vm89_vm1 = vcmask 523264  }
   0xd   :  { %81 = vmatpush.bf16.msra.mxu0 %v122_v0  ;;  %v48_v2 = vld [vmem:[#allocation2] sm:$0xff]  ;;  %v49_v3 = vld [vmem:[#allocation2 + $0x8] sm:$0xff]  ;;  %s215_s26 = smov [#allocation7]   ;;  %s98_s30 = sshll.u32 %s257_s3, 4  ;;  %s99_s30 = int_to_ptr.hbm [resolvable:$true] %s98_s30 }
   0xe   :  { %v50_v4 = vpack.c.bf16 %v49_v3, %v48_v2  ;;  %v130_v5 = vld [vmem:[%s256_s2] ss:$0 sm:$0xff]  ;;  %s96_s27 = sshll.u32 %s215_s26, 4  ;;  %s97_s27 = int_to_ptr.vmem [resolvable:$true] %s96_s27 }
  0x11   :  { %82 = vmatpush.bf16.msra.mxu0 %v121_v1 }
  0x14   :  { %120 = vmatmul.msk.bf16.vlgmr.msra.gmra.mxu0 %vm71_vm0, %v50_v4 }
  0x91   :  { %v84_v6 = vpop.f32.mrf.mxu0 }
  0x92   :  { %v85_v7 = vadd.f32 %v130_v5, %v84_v6 }
  0x94   :  { %90 = vst.msk [vmem:[#allocation7] sm:$0xff] %vm89_vm1, %v85_v7 }
  0x99   :  { %v86_v8 = vpop.f32.mrf.mxu0 }
  0x9a   :  { %v87_v9 = vadd.f32 %v130_v5, %v86_v8 }
  0x9c   :  { %91 = vst.msk [vmem:[#allocation7 + $0x8] sm:$0xff] %vm89_vm1, %v87_v9 }
  0x9d   :  { %104 = dma.vmem_to_hbm [thread:$0]  %s97_s27, 256, %s99_s30, [#allocation4], %s210_s20, %s210_s20, %s211_s21  }
  0x9e   :  { %207 = dma.done.wait [#allocation4], 256  }
  0x9f   :  { %208 = vsyncadd [#allocation4], 4294967040 }
  0xa0   :  { %109 = vsyncpa [#allocation3], 1 }
  0xa1   :  { %110 = vsyncpa [#allocation6], 1 }
  0xa2   :  { %111 = vsyncpa [#allocation4], 1 }

</bundles_post_ra>
